<compile_context>
chip_gen: v7x
topology: tpu7x:2x2x1
jax: 0.10.0
libtpu: 0.0.40
codegen_flags: <defaults>
</compile_context>

<pallas_src>
import functools

import jax
import jax.numpy as jnp
from jax import lax
from jax.experimental import pallas as pl
from jax.experimental.pallas import tpu as pltpu


def _round_up(n, m):
    return (n + m - 1) // m * m


def _cdiv(a, b):
    return (a + b - 1) // b


def mynet1_kernel(xt_ref, w1x_ref, w1t_ref, b1_ref,
                  w2_ref, b2_ref, w3_ref, b3_ref, w4_ref, b4_ref,
                  out_ref, *, n_chunks, unroll):
    """One batch tile = `n_chunks` lane-chunks.

    xt_ref:  (n_chunks, 2, chunk)  rows 0/1 = x/t, batch on lanes (f32)
    out_ref: (n_chunks, 1, chunk)  lane-dense output (f32)
    Weights are VMEM-resident; per-chunk activations stay vreg-resident
    through all four layers (no inter-layer VMEM round trip).
    """
    w1x = w1x_ref[...]            # (H0, 1) f32
    w1t = w1t_ref[...]            # (H0, 1) f32
    b1 = b1_ref[...]              # (H0, 1) f32
    w2 = w2_ref[...]              # (H1, H0) compute dtype (bf16 default)
    b2 = b2_ref[...]              # (H1, 1) f32
    w3 = w3_ref[...]              # (H2, H1) compute dtype
    b3 = b3_ref[...]              # (H2, 1) f32
    w4 = w4_ref[...]              # (H2, 1) f32
    b4 = b4_ref[...]              # (1, 1)  f32

    def body(c, carry):
        xt = xt_ref[c]                                      # (2, chunk)
        x = xt[0:1, :]                                      # (1, chunk)
        t = xt[1:2, :]                                      # (1, chunk)

        # Layer 1: K=2 contraction as VPU broadcast FMAs (no concat, no
        # degenerate-K MXU push).  tanh on the EUP, f32.
        a = jnp.tanh(w1x * x + w1t * t + b1)                # (H0, chunk)

        # Hidden layers on the MXU: bf16 operands (native MXU dtype on
        # v5e/v6e/v7x), f32 accumulation, f32 bias + tanh.
        a = jnp.tanh(jnp.dot(w2, a.astype(w2.dtype),
                             preferred_element_type=jnp.float32) + b2)
        a = jnp.tanh(jnp.dot(w3, a.astype(w3.dtype),
                             preferred_element_type=jnp.float32) + b3)

        # Output layer (D_out == 1): broadcast-multiply + sublane reduce keeps
        # the result lane-dense -> wide stores, no 1/128-lane masked column.
        out = jnp.sum(a * w4, axis=0, keepdims=True) + b4   # (1, chunk)
        out_ref[c] = out.astype(out_ref.dtype)
        return carry

    lax.fori_loop(0, n_chunks, body, 0, unroll=unroll)


def mynet1_forward(x, t, params, *, block_n=32768, chunk=512, min_grid=8,
                   compute_dtype=jnp.bfloat16):
    """x: (N, 1), t: (N, 1).  params = ((w1,b1),...,(w4,b4)) with w_k as
    (in_features, out_features) and b_k as (1, out_features).  Returns (N,1) f32."""
    (w1, b1), (w2, b2), (w3, b3), (w4, b4) = params
    N = x.shape[0]
    H0, H1, H2 = w1.shape[1], w2.shape[1], w3.shape[1]
    d_out = w4.shape[1]
    assert w1.shape[0] == x.shape[1] + t.shape[1] == 2
    assert d_out == 1

    # --- tiling -------------------------------------------------------------
    # chunk : lanes per inner fori_loop step (activations vreg-resident).
    # tile  : cpt * chunk lanes per grid step (amortizes ~0.35us/step).
    # grid  : >= min_grid steps when N allows (v7x megacore + pipelining).
    chunk = _round_up(max(chunk, 128), 128)
    n_chunks = _cdiv(N, chunk)
    max_cpt = max(1, block_n // chunk)                 # cap on chunks per tile
    grid_target = max(min_grid, _cdiv(n_chunks, max_cpt))
    cpt = max(1, _cdiv(n_chunks, grid_target))         # chunks per tile
    grid_len = _cdiv(n_chunks, cpt)
    n_chunks_pad = grid_len * cpt
    n_pad = n_chunks_pad * chunk

    f32 = jnp.float32
    x_flat = jnp.pad(x.astype(f32).reshape(N), (0, n_pad - N))
    t_flat = jnp.pad(t.astype(f32).reshape(N), (0, n_pad - N))
    # (n_chunks_pad, 2, chunk): chunk index leads, x/t rows on sublanes,
    # batch on lanes -> in-kernel access is a plain leading-axis index.
    xt = jnp.stack([x_flat.reshape(n_chunks_pad, chunk),
                    t_flat.reshape(n_chunks_pad, chunk)], axis=1)

    # Transposed-layout parameters (features on sublanes).
    w1x = w1[0].reshape(H0, 1).astype(f32)
    w1t = w1[1].reshape(H0, 1).astype(f32)
    b1c = b1.reshape(H0, 1).astype(f32)
    w2t = w2.T.astype(compute_dtype)                   # (H1, H0)
    b2c = b2.reshape(H1, 1).astype(f32)
    w3t = w3.T.astype(compute_dtype)                   # (H2, H1)
    b3c = b3.reshape(H2, 1).astype(f32)
    w4c = w4.reshape(H2, 1).astype(f32)
    b4c = b4.reshape(1, 1).astype(f32)

    def resident(shape):                               # DMA'd once, stays put
        return pl.BlockSpec(shape, lambda i, _s=shape: tuple(0 for _ in _s))

    flops = 2 * n_pad * (2 * H0 + H0 * H1 + H1 * H2 + H2 * d_out)
    transcendentals = n_pad * (H0 + H1 + H2)
    weight_bytes = sum(int(a.size) * a.dtype.itemsize
                       for a in (w1x, w1t, b1c, w2t, b2c, w3t, b3c, w4c, b4c))
    bytes_accessed = 3 * n_pad * 4 + weight_bytes

    kernel = functools.partial(mynet1_kernel, n_chunks=cpt,
                               unroll=True if cpt <= 8 else 8)

    out3 = pl.pallas_call(
        kernel,
        out_shape=jax.ShapeDtypeStruct((n_chunks_pad, 1, chunk), f32),
        grid=(grid_len,),
        in_specs=[
            pl.BlockSpec((cpt, 2, chunk), lambda i: (i, 0, 0)),
            resident((H0, 1)), resident((H0, 1)), resident((H0, 1)),
            resident((H1, H0)), resident((H1, 1)),
            resident((H2, H1)), resident((H2, 1)),
            resident((H2, 1)), resident((1, 1)),
        ],
        out_specs=pl.BlockSpec((cpt, 1, chunk), lambda i: (i, 0, 0)),
        compiler_params=pltpu.CompilerParams(
            dimension_semantics=("parallel",)),
        cost_estimate=pl.CostEstimate(
            flops=flops, transcendentals=transcendentals,
            bytes_accessed=bytes_accessed),
    )(xt, w1x, w1t, b1c, w2t, b2c, w3t, b3c, w4c, b4c)

    return out3.reshape(n_pad)[:N].reshape(N, 1)


def init_linear(key, fan_in, fan_out):
    """Deterministic PyTorch-style Linear init; weight returned as (in, out)."""
    kw, kb = jax.random.split(key)
    bound = 1.0 / jnp.sqrt(fan_in)
    w = jax.random.uniform(kw, (fan_in, fan_out), jnp.float32, -bound, bound)
    b = jax.random.uniform(kb, (1, fan_out), jnp.float32, -bound, bound)
    return w, b


def reference_forward(x, t, params):
    xt = jnp.concatenate([x, t], axis=1)
    (w1, b1), (w2, b2), (w3, b3), (w4, b4) = params
    f = jnp.tanh(xt @ w1 + b1)
    f = jnp.tanh(f @ w2 + b2)
    f = jnp.tanh(f @ w3 + b3)
    return f @ w4 + b4


if __name__ == "__main__":
    D_in, H, D_out = 2, [32, 32, 32], 1

    key = jax.random.PRNGKey(0)
    k_x, k_t, k1, k2, k3, k4 = jax.random.split(key, 6)
    params = (
        init_linear(k1, D_in, H[0]),
        init_linear(k2, H[0], H[1]),
        init_linear(k3, H[1], H[2]),
        init_linear(k4, H[2], D_out),
    )

    # Case 1: multi-step grid with ragged tail; f32 compute path (tight check).
    N = 300
    x = jax.random.normal(k_x, (N, 1), jnp.float32)
    t = jax.random.normal(k_t, (N, 1), jnp.float32)
    out = jax.block_until_ready(
        mynet1_forward(x, t, params, block_n=128, chunk=128, min_grid=2,
                       compute_dtype=jnp.float32))
    with jax.default_matmul_precision("highest"):
        ref = jax.block_until_ready(reference_forward(x, t, params))
    assert out.shape == (N, D_out)
    assert jnp.allclose(out, ref, atol=1e-3, rtol=1e-3)

    # Case 2: >1 chunk per tile + multi-step grid; default bf16 hidden GEMMs.
    N2 = 2500
    x2 = jax.random.normal(k_x, (N2, 1), jnp.float32)
    t2 = jax.random.normal(k_t, (N2, 1), jnp.float32)
    out2 = jax.block_until_ready(
        mynet1_forward(x2, t2, params, block_n=1024, chunk=512, min_grid=2))
    with jax.default_matmul_precision("highest"):
        ref2 = jax.block_until_ready(reference_forward(x2, t2, params))
    assert out2.shape == (N2, D_out)
    assert jnp.allclose(out2, ref2, atol=5e-2, rtol=5e-2)
    assert float(jnp.mean(jnp.abs(out2 - ref2))) < 1e-2

    # Case 3: tiny batch, single tile, default tiling (bf16 GEMMs).
    N3 = 8
    x3 = jax.random.normal(k_x, (N3, 1), jnp.float32)
    t3 = jax.random.normal(k_t, (N3, 1), jnp.float32)
    out3 = jax.block_until_ready(mynet1_forward(x3, t3, params))
    with jax.default_matmul_precision("highest"):
        ref3 = jax.block_until_ready(reference_forward(x3, t3, params))
    assert out3.shape == (N3, D_out)
    assert jnp.allclose(out3, ref3, atol=5e-2, rtol=5e-2)

    print("KERNEL_OK")
</pallas_src>

<mosaic_0001>
module attributes {stable_mosaic.version = 11 : i64} {
  func.func @mynet1_kernel(%arg0: i32, %arg1: memref<1x2x128xf32, #tpu.memory_space<vmem>>, %arg2: memref<32x1xf32, #tpu.memory_space<vmem>>, %arg3: memref<32x1xf32, #tpu.memory_space<vmem>>, %arg4: memref<32x1xf32, #tpu.memory_space<vmem>>, %arg5: memref<32x32xf32, #tpu.memory_space<vmem>>, %arg6: memref<32x1xf32, #tpu.memory_space<vmem>>, %arg7: memref<32x32xf32, #tpu.memory_space<vmem>>, %arg8: memref<32x1xf32, #tpu.memory_space<vmem>>, %arg9: memref<32x1xf32, #tpu.memory_space<vmem>>, %arg10: memref<1x1xf32, #tpu.memory_space<vmem>>, %arg11: memref<1x1x128xf32, #tpu.memory_space<vmem>>) attributes {dimension_semantics = [#tpu.dimension_semantics<parallel>], iteration_bounds = array<i64: 3>, scalar_prefetch = 0 : i64, scratch_operands = 0 : i64, tpu.core_type = #tpu.core_type<tc>, window_params = [{transform_indices = @transform_0, window_bounds = array<i64: 1, 2, 128>}, {pipeline_mode = #tpu.pipeline_mode<synchronous>, transform_indices = @transform_1, window_bounds = array<i64: 32, 1>}, {pipeline_mode = #tpu.pipeline_mode<synchronous>, transform_indices = @transform_2, window_bounds = array<i64: 32, 1>}, {pipeline_mode = #tpu.pipeline_mode<synchronous>, transform_indices = @transform_3, window_bounds = array<i64: 32, 1>}, {pipeline_mode = #tpu.pipeline_mode<synchronous>, transform_indices = @transform_4, window_bounds = array<i64: 32, 32>}, {pipeline_mode = #tpu.pipeline_mode<synchronous>, transform_indices = @transform_5, window_bounds = array<i64: 32, 1>}, {pipeline_mode = #tpu.pipeline_mode<synchronous>, transform_indices = @transform_6, window_bounds = array<i64: 32, 32>}, {pipeline_mode = #tpu.pipeline_mode<synchronous>, transform_indices = @transform_7, window_bounds = array<i64: 32, 1>}, {pipeline_mode = #tpu.pipeline_mode<synchronous>, transform_indices = @transform_8, window_bounds = array<i64: 32, 1>}, {pipeline_mode = #tpu.pipeline_mode<synchronous>, transform_indices = @transform_9, window_bounds = array<i64: 1, 1>}, {transform_indices = @transform_10, window_bounds = array<i64: 1, 1, 128>}]} {
    %c0 = arith.constant 0 : index
    %c0_0 = arith.constant 0 : index
    %0 = vector.load %arg2[%c0, %c0_0] : memref<32x1xf32, #tpu.memory_space<vmem>>, vector<32x1xf32>
    %c0_1 = arith.constant 0 : index
    %c0_2 = arith.constant 0 : index
    %1 = vector.load %arg3[%c0_1, %c0_2] : memref<32x1xf32, #tpu.memory_space<vmem>>, vector<32x1xf32>
    %c0_3 = arith.constant 0 : index
    %c0_4 = arith.constant 0 : index
    %2 = vector.load %arg4[%c0_3, %c0_4] : memref<32x1xf32, #tpu.memory_space<vmem>>, vector<32x1xf32>
    %c0_5 = arith.constant 0 : index
    %c0_6 = arith.constant 0 : index
    %3 = vector.load %arg5[%c0_5, %c0_6] : memref<32x32xf32, #tpu.memory_space<vmem>>, vector<32x32xf32>
    %c0_7 = arith.constant 0 : index
    %c0_8 = arith.constant 0 : index
    %4 = vector.load %arg6[%c0_7, %c0_8] : memref<32x1xf32, #tpu.memory_space<vmem>>, vector<32x1xf32>
    %c0_9 = arith.constant 0 : index
    %c0_10 = arith.constant 0 : index
    %5 = vector.load %arg7[%c0_9, %c0_10] : memref<32x32xf32, #tpu.memory_space<vmem>>, vector<32x32xf32>
    %c0_11 = arith.constant 0 : index
    %c0_12 = arith.constant 0 : index
    %6 = vector.load %arg8[%c0_11, %c0_12] : memref<32x1xf32, #tpu.memory_space<vmem>>, vector<32x1xf32>
    %c0_13 = arith.constant 0 : index
    %c0_14 = arith.constant 0 : index
    %7 = vector.load %arg9[%c0_13, %c0_14] : memref<32x1xf32, #tpu.memory_space<vmem>>, vector<32x1xf32>
    %c0_15 = arith.constant 0 : index
    %c0_16 = arith.constant 0 : index
    %8 = vector.load %arg10[%c0_15, %c0_16] : memref<1x1xf32, #tpu.memory_space<vmem>>, vector<1x1xf32>
    %c0_i32 = arith.constant 0 : i32
    %9 = arith.index_cast %c0_i32 : i32 to index
    %c0_17 = arith.constant 0 : index
    %c0_18 = arith.constant 0 : index
    %10 = vector.load %arg1[%9, %c0_17, %c0_18] : memref<1x2x128xf32, #tpu.memory_space<vmem>>, vector<1x2x128xf32>
    %11 = vector.shape_cast %10 : vector<1x2x128xf32> to vector<2x128xf32>
    %12 = vector.extract_strided_slice %11 {offsets = [0, 0], sizes = [1, 128], strides = [1, 1]} : vector<2x128xf32> to vector<1x128xf32>
    %13 = vector.extract_strided_slice %11 {offsets = [1, 0], sizes = [1, 128], strides = [1, 1]} : vector<2x128xf32> to vector<1x128xf32>
    %14 = vector.broadcast %0 : vector<32x1xf32> to vector<32x128xf32>
    %15 = vector.broadcast %12 : vector<1x128xf32> to vector<32x128xf32>
    %16 = arith.mulf %14, %15 : vector<32x128xf32>
    %17 = vector.broadcast %1 : vector<32x1xf32> to vector<32x128xf32>
    %18 = vector.broadcast %13 : vector<1x128xf32> to vector<32x128xf32>
    %19 = arith.mulf %17, %18 : vector<32x128xf32>
    %20 = arith.addf %16, %19 : vector<32x128xf32>
    %21 = vector.broadcast %2 : vector<32x1xf32> to vector<32x128xf32>
    %22 = arith.addf %20, %21 : vector<32x128xf32>
    %23 = math.tanh %22 : vector<32x128xf32>
    %cst = arith.constant dense<0.000000e+00> : vector<32x128xf32>
    %24 = tpu.matmul %3, %23, %cst {dimension_numbers = #tpu.dot_dimension_numbers<[1], [0], [0], [1], [0, 0, 1, 1], [], []>} : vector<32x32xf32>, vector<32x128xf32>, vector<32x128xf32> -> vector<32x128xf32>
    %25 = vector.broadcast %4 : vector<32x1xf32> to vector<32x128xf32>
    %26 = arith.addf %24, %25 : vector<32x128xf32>
    %27 = math.tanh %26 : vector<32x128xf32>
    %cst_19 = arith.constant dense<0.000000e+00> : vector<32x128xf32>
    %28 = tpu.matmul %5, %27, %cst_19 {dimension_numbers = #tpu.dot_dimension_numbers<[1], [0], [0], [1], [0, 0, 1, 1], [], []>} : vector<32x32xf32>, vector<32x128xf32>, vector<32x128xf32> -> vector<32x128xf32>
    %29 = vector.broadcast %6 : vector<32x1xf32> to vector<32x128xf32>
    %30 = arith.addf %28, %29 : vector<32x128xf32>
    %31 = math.tanh %30 : vector<32x128xf32>
    %32 = vector.broadcast %7 : vector<32x1xf32> to vector<32x128xf32>
    %33 = arith.mulf %31, %32 : vector<32x128xf32>
    %cst_20 = arith.constant dense<0.000000e+00> : vector<128xf32>
    %34 = vector.multi_reduction <add>, %33, %cst_20 [0] : vector<32x128xf32> to vector<128xf32>
    %35 = vector.shape_cast %34 : vector<128xf32> to vector<1x128xf32>
    %36 = vector.broadcast %8 : vector<1x1xf32> to vector<1x128xf32>
    %37 = arith.addf %35, %36 : vector<1x128xf32>
    %38 = arith.index_cast %c0_i32 : i32 to index
    %c0_21 = arith.constant 0 : index
    %c0_22 = arith.constant 0 : index
    %39 = vector.load %arg11[%38, %c0_21, %c0_22] : memref<1x1x128xf32, #tpu.memory_space<vmem>>, vector<1x1x128xf32>
    %40 = vector.shape_cast %39 : vector<1x1x128xf32> to vector<1x128xf32>
    %41 = vector.shape_cast %37 : vector<1x128xf32> to vector<1x1x128xf32>
    tpu.vector_store %arg11[%38, %c0_21, %c0_22], %41 {strides = array<i32>} : memref<1x1x128xf32, #tpu.memory_space<vmem>>, vector<1x1x128xf32>,
    %c1_i32 = arith.constant 1 : i32
    return
  }
  func.func @transform_0(%arg0: i32) -> (i32, i32, i32) {
    %c0_i32 = arith.constant 0 : i32
    %c0_i32_0 = arith.constant 0 : i32
    %c0_i32_1 = arith.constant 0 : i32
    return %arg0, %c0_i32, %c0_i32_0 : i32, i32, i32
  }
  func.func @transform_1(%arg0: i32) -> (i32, i32) {
    %c0_i32 = arith.constant 0 : i32
    %c0_i32_0 = arith.constant 0 : i32
    %c0_i32_1 = arith.constant 0 : i32
    return %c0_i32, %c0_i32_0 : i32, i32
  }
  func.func @transform_2(%arg0: i32) -> (i32, i32) {
    %c0_i32 = arith.constant 0 : i32
    %c0_i32_0 = arith.constant 0 : i32
    %c0_i32_1 = arith.constant 0 : i32
    return %c0_i32, %c0_i32_0 : i32, i32
  }
  func.func @transform_3(%arg0: i32) -> (i32, i32) {
    %c0_i32 = arith.constant 0 : i32
    %c0_i32_0 = arith.constant 0 : i32
    %c0_i32_1 = arith.constant 0 : i32
    return %c0_i32, %c0_i32_0 : i32, i32
  }
  func.func @transform_4(%arg0: i32) -> (i32, i32) {
    %c0_i32 = arith.constant 0 : i32
    %c0_i32_0 = arith.constant 0 : i32
    %c0_i32_1 = arith.constant 0 : i32
    return %c0_i32, %c0_i32_0 : i32, i32
  }
  func.func @transform_5(%arg0: i32) -> (i32, i32) {
    %c0_i32 = arith.constant 0 : i32
    %c0_i32_0 = arith.constant 0 : i32
    %c0_i32_1 = arith.constant 0 : i32
    return %c0_i32, %c0_i32_0 : i32, i32
  }
  func.func @transform_6(%arg0: i32) -> (i32, i32) {
    %c0_i32 = arith.constant 0 : i32
    %c0_i32_0 = arith.constant 0 : i32
    %c0_i32_1 = arith.constant 0 : i32
    return %c0_i32, %c0_i32_0 : i32, i32
  }
  func.func @transform_7(%arg0: i32) -> (i32, i32) {
    %c0_i32 = arith.constant 0 : i32
    %c0_i32_0 = arith.constant 0 : i32
    %c0_i32_1 = arith.constant 0 : i32
    return %c0_i32, %c0_i32_0 : i32, i32
  }
  func.func @transform_8(%arg0: i32) -> (i32, i32) {
    %c0_i32 = arith.constant 0 : i32
    %c0_i32_0 = arith.constant 0 : i32
    %c0_i32_1 = arith.constant 0 : i32
    return %c0_i32, %c0_i32_0 : i32, i32
  }
  func.func @transform_9(%arg0: i32) -> (i32, i32) {
    %c0_i32 = arith.constant 0 : i32
    %c0_i32_0 = arith.constant 0 : i32
    %c0_i32_1 = arith.constant 0 : i32
    return %c0_i32, %c0_i32_0 : i32, i32
  }
  func.func @transform_10(%arg0: i32) -> (i32, i32, i32) {
    %c0_i32 = arith.constant 0 : i32
    %c0_i32_0 = arith.constant 0 : i32
    %c0_i32_1 = arith.constant 0 : i32
    return %arg0, %c0_i32, %c0_i32_0 : i32, i32, i32
  }
}

</mosaic_0001>

<bundles_post_ra>
// kernel: tpu_custom_call.1
= control target key start
LH: loop header
LB: loop body
LE: loop exit
PB: predicated region body
PF: predicated region fallthrough
CT: control target
= control target key end

     0   :  { %s1311_s0 = inlined_call_operand.vmem [shape: f32[3,2,128], index: 0, kind: input, shape index: {}]   ;;  %s1312_s1 = inlined_call_operand.vmem [shape: f32[32,1], index: 1, kind: input, shape index: {}]   ;;  %s1313_s2 = inlined_call_operand.vmem [shape: f32[32,1], index: 2, kind: input, shape index: {}]   ;;  %s1314_s3 = inlined_call_operand.vmem [shape: f32[32,1], index: 3, kind: input, shape index: {}]   ;;  %s1315_s4 = inlined_call_operand.vmem [shape: f32[32,32], index: 4, kind: input, shape index: {}]   ;;  %s1316_s5 = inlined_call_operand.vmem [shape: f32[32,1], index: 5, kind: input, shape index: {}]   ;;  %s1317_s6 = inlined_call_operand.vmem [shape: f32[32,32], index: 6, kind: input, shape index: {}]   ;;  %s1318_s7 = inlined_call_operand.vmem [shape: f32[32,1], index: 7, kind: input, shape index: {}]   ;;  %s1319_s8 = inlined_call_operand.vmem [shape: f32[32,1], index: 8, kind: input, shape index: {}]   ;;  %s1320_s9 = inlined_call_operand.<no memory space> [shape: f32[1,1], index: 9, kind: input, shape index: {}]   ;;  %s1321_s10 = inlined_call_operand.hbm [shape: f32[3,1,128], index: 10, kind: output, shape index: {}]  }
   0x1   :  { %v15_v0 = vstv %s1320_s9 }
   0x2   :  { %16 = vst [vmem:[#allocation2] sm:$0x1] %v15_v0 }
   0x3   :  { %17 = vsyncpa [#allocation4], 0 }
   0x4   :  { %19 = vsyncpa [#allocation4 + $0x1], 0  ;;  %s1099_s15 = smov 0   ;;  %s1101_s16 = smov 0  }
   0x5   :  { %s1103_s17 = smov 0   ;;  %s1105_s18 = smov 0  }
   0x6 LB: > { %s1120_s9 = sadd.s32 4294967295, %s1037_s18   ;;  %s833_s19 = sadd.s32 4294967294, %s1037_s18   ;;  %s1037_s18 = sphi %s1105_s18, %s1327_s18   ;;  %s1033_s17 = sphi %s1103_s17, %s1326_s17   ;;  %s1029_s16 = sphi %s1101_s16, %s1325_s16   ;;  %s1025_s15 = sphi %s1099_s15, %s1324_s15  }
   0x7   : > { %s1124_s20 = sadd.s32 1, %s1037_s18   ;;  %s247_s21 = sadd.s32 1, %s1033_s17 }
   0x8   : > { %s244_s22 = ssub.s32 %s1037_s18, %s1124_s20  ;;  %p257_p0 = scmp.ne.s32.totalorder %s1033_s17, %s1029_s16 }
   0x9   : > { %p245_p1 = scmp.eq.s32.totalorder %s244_s22, 0  ;;  %p258_p2 = scmp.eq.s32.totalorder %s1120_s9, 2 }
   0xa   : > { %p263_p3 = scmp.ne.s32.totalorder %s1029_s16, %s1025_s15  ;;  %p264_p4 = scmp.eq.s32.totalorder %s833_s19, 2 }
   0xb   : > { %s1135_s23 = scalar_select %p245_p1, %s1033_s17, %s247_s21  }
   0xc   : > { %p1137_p5 = por %p258_p2, %p257_p0  ;;  %p1141_p6 = por %p264_p4, %p263_p3 }
   0xd   : > { %p836_p7 = scmp.ge.s32.totalorder %s1037_s18, 1  ;;  %p316_p8 = scmp.lt.s32.totalorder %s1037_s18, 4 }
   0xf   : > { %p317_p9 = pnand %p836_p7, %p316_p8 }
  0x10   : > { %v360_v1 = vld [vmem:[%s1313_s2] sm:$0xff] (!%p317_p9)  ;;  %v1039_v3 = vmov (!%p317_p9), 0   ;;  %v361_v4 = vld [vmem:[%s1313_s2 + $0x8] sm:$0xff] (!%p317_p9)  ;;  %v359_v6 = vld [vmem:[%s1312_s1 + $0x18] sm:$0xff] (!%p317_p9)  ;;  %vm498_vm0 = vcmask (!%p317_p9), 261120   ;;  %p352_p10 = scmp.lt.s32.totalorder (!%p317_p9), %s1120_s9, 2  ;;  %v410_v28 = vlaneseq (!%p317_p9) }
  0x11   : > { %320 = sbr.rel (%p317_p9) target bundleno = 686 (0x2ae), region = 60  ;;  %v356_v2 = vld [vmem:[%s1312_s1] sm:$0xff] (!%p317_p9)  ;;  %950 = vset.pattern.permute.xlu1 (!%p317_p9), %v1039_v3  ;;  %949 = vset.pattern.permute.xlu0 (!%p317_p9), %v1039_v3  ;;  %v357_v5 = vld [vmem:[%s1312_s1 + $0x8] sm:$0xff] (!%p317_p9)  ;;  %v358_v7 = vld [vmem:[%s1312_s1 + $0x10] sm:$0xff] (!%p317_p9)  ;;  %s350_s19 = sand.u32 (!%p317_p9), 1, %s1029_s16  }
  0x12   : > { %420 = vperm.xlu1 (!%p317_p9), %950, %v360_v1   ;;  %392 = vperm.xlu0 (!%p317_p9), %949, %v356_v2   ;;  %v363_v8 = vld [vmem:[%s1313_s2 + $0x18] sm:$0xff] (!%p317_p9)  ;;  %v362_v9 = vld [vmem:[%s1313_s2 + $0x10] sm:$0xff] (!%p317_p9)  ;;  %v365_v10 = vld [vmem:[%s1314_s3 + $0x8] sm:$0xff] (!%p317_p9)  ;;  %v1225_v29 = vshrl.u32 (!%p317_p9), %v410_v28, 7  ;;  %s846_s21 = sshll.u32 (!%p317_p9), %s1120_s9, 4  ;;  %s351_s22 = scalar_lea.vmem (!%p317_p9), [#allocation3], %s350_s19 }
  0x13   : > { %v364_v11 = vld [vmem:[%s1314_s3] sm:$0xff] (!%p317_p9)  ;;  %v367_v12 = vld [vmem:[%s1314_s3 + $0x18] sm:$0xff] (!%p317_p9)  ;;  %v366_v13 = vld [vmem:[%s1314_s3 + $0x10] sm:$0xff] (!%p317_p9)  ;;  %s778_s26 = sshll.u32 (!%p317_p9), %s351_s22, 4  ;;  %s766_s30 = scalar_lea.sflag (!%p317_p9), [#allocation4], %s350_s19  ;;  %s1271_s26 = int_to_ptr.vmem [resolvable:$true] %s778_s26 }
  0x14   : > { %v373_v14 = vld [vmem:[%s1316_s5 + $0x8] sm:$0xff] (!%p317_p9)  ;;  %v372_v15 = vld [vmem:[%s1316_s5] sm:$0xff] (!%p317_p9)  ;;  %v375_v16 = vld [vmem:[%s1316_s5 + $0x18] sm:$0xff] (!%p317_p9)  ;;  %v440_v32 = vsub.s32 (!%p317_p9), 1, %v1225_v29  ;;  %v412_v33 = vsub.s32 (!%p317_p9), 0, %v1225_v29  ;;  %s1040_s11 = smov (!%p317_p9), [#allocation3]  }
  0x15   : > { %v374_v17 = vld [vmem:[%s1316_s5 + $0x10] sm:$0xff] (!%p317_p9)  ;;  %v381_v18 = vld [vmem:[%s1318_s7 + $0x8] sm:$0xff] (!%p317_p9)  ;;  %v380_v19 = vld [vmem:[%s1318_s7] sm:$0xff] (!%p317_p9) }
  0x16   : > { %425 = vperm.xlu1 (!%p317_p9), %950, %v361_v4   ;;  %397 = vperm.xlu0 (!%p317_p9), %949, %v357_v5   ;;  %v383_v20 = vld [vmem:[%s1318_s7 + $0x18] sm:$0xff] (!%p317_p9)  ;;  %v382_v21 = vld [vmem:[%s1318_s7 + $0x10] sm:$0xff] (!%p317_p9)  ;;  %v385_v22 = vld [vmem:[%s1319_s8 + $0x8] sm:$0xff] (!%p317_p9) }
  0x17   : > { %v384_v23 = vld [vmem:[%s1319_s8] sm:$0xff] (!%p317_p9)  ;;  %v387_v25 = vld [vmem:[%s1319_s8 + $0x18] sm:$0xff] (!%p317_p9)  ;;  %v386_v26 = vld [vmem:[%s1319_s8 + $0x10] sm:$0xff] (!%p317_p9) }
  0x18   : > { %v368_v24 = vld [vmem:[%s1315_s4] sm:$0xff]  ;;  %s353_s28 = scalar_select %p352_p10, %s1120_s9, 2  ;;  %v369_v5 = vld [vmem:[%s1315_s4 + $0x8] sm:$0xff]  ;;  %v378_v28 = vld [vmem:[%s1317_s6 + $0x10] sm:$0xff] }
  0x19   : > { %873 = vmatprep.mubr.msk.f32.mxu0 %vm498_vm0, %v368_v24  ;;  %v388_v27 = vld [vmem:[#allocation2] sm:$0x1]  ;;  %s975_s9 = scalar_lea.vmem %s1271_s26, 16 }
  0x1a   : > { %407 = vperm.xlu1 %950, %v359_v6   ;;  %402 = vperm.xlu0 %949, %v358_v7   ;;  %s837_s29 = sshll.u32 %s353_s28, 1  ;;  %v370_v6 = vld [vmem:[%s1315_s4 + $0x10] sm:$0xff]  ;;  %v371_v7 = vld [vmem:[%s1315_s4 + $0x18] sm:$0xff]  ;;  %p976_p11 = scmp.ne.s32.totalorder %s1271_s26, %s975_s9 }
  0x1b   : > { %s355_s12 = scalar_lea.vmem %s1311_s0, %s837_s29  ;;  %s1269_s29 = scalar_lea.hbm %s1321_s10, %s846_s21 }
  0x1c   : > { %v389_v34 = vld [vmem:[%s355_s12] sm:$0x3]  ;;  %p977_p12 = pnand %p976_p11, %p1137_p5  ;;  %s979_s12 = sshll.u32 %s1040_s11, 4  ;;  %s980_s12 = int_to_ptr.vmem [resolvable:$false] %s979_s12 }
  0x1d   : > { %v441_v37 = vrot.slane %v389_v34, %v440_v32  ;;  %v413_v38 = vrot.slane %v389_v34, %v412_v33  ;;  %s981_s13 = scalar_lea.vmem %s980_s12, 32  ;;  %p982_p0 = scmp.lt.s32.totalorder %s1271_s26, %s980_s12 }
  0x1e   : > { %435 = vperm.xlu1 %950, %v363_v8   ;;  %430 = vperm.xlu0 %949, %v362_v9   ;;  %v376_v8 = vld [vmem:[%s1317_s6] sm:$0xff]  ;;  %p978_p13 = pneg %p977_p12  ;;  %p983_p1 = scmp.lt.s32.totalorder %s981_s13, %s975_s9 }
  0x1f   : > { %887 = vmatprep.mubr.msk.f32.mxu1 %vm498_vm0, %v376_v8 }
  0x20   : > { %p984_p2 = por %p983_p1, %p982_p0 }
  0x22   : > { %457 = vperm.xlu1 %950, %v365_v10   ;;  %452 = vperm.xlu0 %949, %v364_v11   ;;  %p985_p3 = pnand %p984_p2, %p978_p13 }
  0x26   : > { %467 = vperm.xlu1 %950, %v367_v12   ;;  %462 = vperm.xlu0 %949, %v366_v13  }
  0x2a   : > { %485 = vperm.xlu1 %950, %v373_v14   ;;  %480 = vperm.xlu0 %949, %v372_v15  }
  0x2e   : > { %495 = vperm.xlu1 %950, %v375_v16   ;;  %490 = vperm.xlu0 %949, %v374_v17  }
  0x32   : > { %607 = vperm.xlu1 %950, %v381_v18   ;;  %602 = vperm.xlu0 %949, %v380_v19  }
  0x36   : > { %617 = vperm.xlu1 %950, %v383_v20   ;;  %612 = vperm.xlu0 %949, %v382_v21  }
  0x3a   : > { %728 = vperm.xlu1 %950, %v385_v22   ;;  %723 = vperm.xlu0 %949, %v384_v23  }
  0x3e   : > { %738 = vperm.xlu1 %950, %v387_v25   ;;  %733 = vperm.xlu0 %949, %v386_v26  }
  0x42   : > { %756 = vperm.xlu0 %949, %v388_v27   ;;  %v377_v27 = vld [vmem:[%s1317_s6 + $0x8] sm:$0xff] }
  0x91   : > { %v421_v30 = vpop.permute.xlu1 %420  ;;  %v393_v31 = vpop.permute.xlu0 %392 }
  0x92   : > { %v442_v41 = vmul.f32 %v441_v37, %v421_v30  ;;  %v414_v42 = vmul.f32 %v413_v38, %v393_v31  ;;  %v379_v30 = vld [vmem:[%s1317_s6 + $0x18] sm:$0xff] }
  0x94   : > { %v446_v50 = vadd.f32 %v442_v41, %v414_v42 }
  0x95   : > { %v426_v35 = vpop.permute.xlu1 %425  ;;  %v398_v36 = vpop.permute.xlu0 %397 }
  0x96   : > { %v443_v43 = vmul.f32 %v441_v37, %v426_v35  ;;  %v415_v44 = vmul.f32 %v413_v38, %v398_v36 }
  0x98   : > { %v447_v49 = vadd.f32 %v443_v43, %v415_v44 }
  0x99   : > { %v408_v39 = vpop.permute.xlu1 %407  ;;  %v403_v40 = vpop.permute.xlu0 %402 }
  0x9a   : > { %v417_v53 = vmul.f32 %v413_v38, %v408_v39  ;;  %v416_v54 = vmul.f32 %v413_v38, %v403_v40 }
  0x9d   : > { %v436_v45 = vpop.permute.xlu1 %435  ;;  %v431_v46 = vpop.permute.xlu0 %430 }
  0x9e   : > { %v445_v47 = vmul.f32 %v441_v37, %v436_v45  ;;  %v444_v48 = vmul.f32 %v441_v37, %v431_v46 }
  0xa0   : > { %v449_v57 = vadd.f32 %v445_v47, %v417_v53  ;;  %v448_v58 = vadd.f32 %v444_v48, %v416_v54 }
  0xa1   : > { %v458_v51 = vpop.permute.xlu1 %457  ;;  %v453_v52 = vpop.permute.xlu0 %452 }
  0xa2   : > { %v471_v55 = vadd.f32 %v458_v51, %v447_v49  ;;  %v470_v56 = vadd.f32 %v453_v52, %v446_v50 }
  0xa4   : > { %951 = vtanh.f32 %v471_v55 }
  0xa5   : > { %953 = vtanh.f32 %v470_v56  ;;  %v468_v59 = vpop.permute.xlu1 %467  ;;  %v463_v60 = vpop.permute.xlu0 %462 }
  0xa6   : > { %v473_v61 = vadd.f32 %v468_v59, %v449_v57  ;;  %v472_v62 = vadd.f32 %v463_v60, %v448_v58 }
  0xa8   : > { %955 = vtanh.f32 %v473_v61 }
  0xa9   : > { %957 = vtanh.f32 %v472_v62  ;;  %v486_v9 = vpop.permute.xlu1 %485  ;;  %v481_v10 = vpop.permute.xlu0 %480 }
  0xad   : > { %v496_v15 = vpop.permute.xlu1 %495  ;;  %v491_v17 = vpop.permute.xlu0 %490 }
  0xae   : > { %v952_v63 = vpop.eup %951 }
  0xaf   : > { %v954_v0 = vpop.eup %953 }
  0xb0   : > { %v893_v1 = vpack.c.bf16 %v952_v63, %v954_v0 }
  0xb1   : > { %v608_v31 = vpop.permute.xlu1 %607  ;;  %v603_v32 = vpop.permute.xlu0 %602 }
  0xb2   : > { %v956_v2 = vpop.eup %955  ;;  %894 = vmatprep.subr.bf16.mxu0 %v893_v1 }
  0xb3   : > { %v958_v3 = vpop.eup %957  ;;  %896 = vmatpush3.bf16.msra.mxu0 %v893_v1 }
  0xb4   : > { %v897_v4 = vpack.c.bf16 %v956_v2, %v958_v3 }
  0xb5   : > { %v618_v38 = vpop.permute.xlu1 %617  ;;  %v613_v40 = vpop.permute.xlu0 %612 }
  0xb6   : > { %898 = vmatprep.subr.bf16.mxu0 %v897_v4 }
  0xb7   : > { %900 = vmatpush3.bf16.msra.mxu0 %v897_v4 }
  0xb9   : > { %v724_v44 = vpop.permute.xlu0 %723  ;;  %v729_v46 = vpop.permute.xlu1 %728 }
  0xba   : > { %874 = vmatmul.mubr.msk.f32.vlgmr.msra.gmra.mrb[0].mxu0 %vm498_vm0, %v369_v5 }
  0xbb   : > { %876 = vmatprep.mubr.msk.f32.mxu0 %vm498_vm0, %v370_v6 }
  0xbd   : > { %v734_v53 = vpop.permute.xlu0 %733  ;;  %v739_v55 = vpop.permute.xlu1 %738 }
  0xbe   : > { %877 = vmatmul.mubr.msk.f32.gmra.mrb[2].mxu0 %vm498_vm0, %v371_v7 }
  0xc1   : > { %v757_v63 = vpop.permute.xlu0 %756 }
  0xc2   : > { %v762_v1 = vrot.slane %v757_v63, %v412_v33 }
 0x18d   : > { %v875_v11 = vpop.f32.mrb[0].mxu0 }
 0x18e   : > { %v583_v12 = vadd.f32 %v875_v11, %v486_v9  ;;  %v577_v13 = vpop.f32.mrb[1].mxu0 }
 0x18f   : > { %v578_v14 = vadd.f32 %v577_v13, %v481_v10 }
 0x190   : > { %959 = vtanh.f32 %v583_v12 }
 0x191   : > { %961 = vtanh.f32 %v578_v14  ;;  %v878_v16 = vpop.f32.mrb[2].mxu0 }
 0x192   : > { %v593_v18 = vadd.f32 %v878_v16, %v496_v15  ;;  %v587_v19 = vpop.f32.mrb[3].mxu0 }
 0x193   : > { %v588_v20 = vadd.f32 %v587_v19, %v491_v17 }
 0x194   : > { %963 = vtanh.f32 %v593_v18 }
 0x195   : > { %965 = vtanh.f32 %v588_v20 }
 0x19a   : > { %v960_v21 = vpop.eup %959 }
 0x19b   : > { %v962_v22 = vpop.eup %961 }
 0x19c   : > { %v901_v23 = vpack.c.bf16 %v960_v21, %v962_v22 }
 0x19e   : > { %v964_v24 = vpop.eup %963  ;;  %902 = vmatprep.subr.bf16.mxu1 %v901_v23 }
 0x19f   : > { %v966_v25 = vpop.eup %965  ;;  %904 = vmatpush3.bf16.msra.mxu1 %v901_v23 }
 0x1a0   : > { %v905_v26 = vpack.c.bf16 %v964_v24, %v966_v25 }
 0x1a2   : > { %906 = vmatprep.subr.bf16.mxu1 %v905_v26 }
 0x1a3   : > { %908 = vmatpush3.bf16.msra.mxu1 %v905_v26 }
 0x1a6   : > { %888 = vmatmul.mubr.msk.f32.vlgmr.msra.gmra.mrb[0].mxu1 %vm498_vm0, %v377_v27 }
 0x1a7   : > { %890 = vmatprep.mubr.msk.f32.mxu1 %vm498_vm0, %v378_v28 }
 0x1aa   : > { %891 = vmatmul.mubr.msk.f32.gmra.mrb[2].mxu1 %vm498_vm0, %v379_v30 }
 0x279   : > { %v889_v34 = vpop.f32.mrb[0].mxu1 }
 0x27a   : > { %v704_v35 = vadd.f32 %v889_v34, %v608_v31  ;;  %v698_v36 = vpop.f32.mrb[1].mxu1 }
 0x27b   : > { %v699_v37 = vadd.f32 %v698_v36, %v603_v32 }
 0x27c   : > { %967 = vtanh.f32 %v704_v35 }
 0x27d   : > { %969 = vtanh.f32 %v699_v37  ;;  %v892_v39 = vpop.f32.mrb[2].mxu1 }
 0x27e   : > { %v714_v41 = vadd.f32 %v892_v39, %v618_v38  ;;  %v708_v42 = vpop.f32.mrb[3].mxu1 }
 0x27f   : > { %v709_v43 = vadd.f32 %v708_v42, %v613_v40 }
 0x280   : > { %971 = vtanh.f32 %v714_v41 }
 0x281   : > { %973 = vtanh.f32 %v709_v43 }
 0x286   : > { %v968_v45 = vpop.eup %967 }
 0x287   : > { %v970_v47 = vpop.eup %969  ;;  %v742_v48 = vmul.f32 %v968_v45, %v729_v46 }
 0x288   : > { %v741_v49 = vmul.f32 %v970_v47, %v724_v44 }
 0x28a   : > { %v972_v50 = vpop.eup %971  ;;  %v745_v51 = vadd.f32 %v742_v48, %v741_v49 }
 0x28b   : > { %v974_v52 = vpop.eup %973  ;;  %v744_v56 = vmul.f32 %v972_v50, %v739_v55 }
 0x28c   : > { %v743_v54 = vmul.f32 %v974_v52, %v734_v53 }
 0x28e   : > { %v746_v57 = vadd.f32 %v745_v51, %v743_v54 }
 0x290   : > { %v747_v58 = vadd.f32 %v746_v57, %v744_v56 }
 0x292   : > { %v748_v59 = vrot.slane %v747_v58, 4 }
 0x294   : > { %v749_v60 = vadd.f32 %v748_v59, %v747_v58 }
 0x296   : > { %v750_v61 = vrot.slane %v749_v60, 2 }
 0x298   : > { %v751_v62 = vadd.f32 %v750_v61, %v749_v60 }
 0x29a   : > { %v752_v0 = vrot.slane %v751_v62, 1 }
 0x29c   : > { %v753_v2 = vadd.f32 %v752_v0, %v751_v62 }
 0x29e   : > { %v763_v3 = vadd.f32 %v762_v1, %v753_v2 }
 0x2a0   : > { %764 = vst [vmem:[%s351_s22] sm:$0x1] %v763_v3 }
 0x2a1   : > { %988 = shalt.err (!%p985_p3)
}
 0x2a2   : > { %s989_s14 = scalar_lea.hbm %s1269_s29, 16  ;;  %s993_s22 = scalar_lea.hbm %s1321_s10, 48 }
 0x2a3   : > { %p990_p4 = scmp.ne.s32.totalorder %s1269_s29, %s989_s14  ;;  %p994_p9 = scmp.lt.u32.totalorder %s1269_s29, %s1321_s10 }
 0x2a4   : > { %p995_p10 = scmp.lt.u32.totalorder %s993_s22, %s989_s14  ;;  %p997_p12 = scmp.lt.u32.totalorder %s989_s14, %s1269_s29 }
 0x2a5   : > { %p991_p7 = pnand %p990_p4, %p1137_p5 }
 0x2a6   : > { %p996_p11 = por %p995_p10, %p994_p9 }
 0x2a7   : > { %p992_p8 = pneg %p991_p7 }
 0x2a8   : > { %p998_p13 = por %p997_p12, %p996_p11 }
 0x2aa   : > { %p999_p0 = pnand %p998_p13, %p992_p8 }
 0x2ac   : > { %1002 = shalt.err (!%p999_p0)
}
 0x2ad   : > { %909 = dma.vmem_to_hbm [thread:$0]  (%p1137_p5), %s1271_s26, 16, %s1269_s29, %s766_s30  }
 0x2ae PF: > { %p915_p1 = scmp.ge.s32.totalorder %s1037_s18, 2  ;;  %s790_s9 = sand.u32 1, %s1025_s15  }
 0x2af   : > { %s791_s11 = scalar_lea.sflag [#allocation4], %s790_s9 }
 0x2b0   : > { %p912_p2 = pnand %p915_p1, %p1141_p6 }
 0x2b2   : > { %1020 = dma.done.wait (!%p912_p2), %s791_s11, 16  }
 0x2b3   : > { %1022 = vsyncadd (!%p912_p2), %s791_s11, 4294967280  ;;  %p22_p3 = scmp.ge.s32.totalorder %s1124_s20, 5   ;;  %s1324_s15 = smov %s1029_s16 }
 0x2b4   : > { %s1325_s16 = smov %s1033_s17  ;;  %s1326_s17 = smov %s1135_s23 }
 0x2b5   : > { %s1327_s18 = smov %s1124_s20  ;;  %24 = sbr.rel (!%p22_p3) target bundleno = 6 (0x6), region = 95 }
 0x2bc   :  { %795 = vsyncpa [#allocation4], 1 }
 0x2bd   :  { %797 = vsyncpa [#allocation4 + $0x1], 1 }

</bundles_post_ra>
